<compile_context>
chip_gen: v7x
topology: tpu7x:2x2x1
jax: 0.10.0
libtpu: 0.0.40
codegen_flags: <defaults>
</compile_context>

<pallas_src>
import functools

import jax
import jax.numpy as jnp
from jax.experimental import pallas as pl
from jax.experimental.pallas import tpu as pltpu


def _round_up(n, m):
    return ((n + m - 1) // m) * m


def _mlp_kernel(x_ref, w1_ref, w2_ref, wh_ref, b_ref, out_ref):
    # Packed bias table: row 0 -> fc1 (256), row 1 -> fc2 (128), row 2 -> heads.
    bias = b_ref[...]                        # (3, bias_cols) f32
    b1 = bias[0:1, :256]
    b2 = bias[1:2, :128]
    bh = bias[2:3, :out_ref.shape[-1]]

    # fc1 -> relu  (bf16 MXU operands, f32 accumulate + elementwise)
    x = x_ref[...]
    if x.dtype != jnp.bfloat16:
        x = x.astype(jnp.bfloat16)
    h1 = jnp.dot(x, w1_ref[...], preferred_element_type=jnp.float32) + b1
    h1 = jnp.maximum(h1, 0.0)

    # fc2 -> relu
    h2 = jnp.dot(h1.astype(jnp.bfloat16), w2_ref[...],
                 preferred_element_type=jnp.float32) + b2
    h2 = jnp.maximum(h2, 0.0)

    # fused joystick|buttons head -> sigmoid (narrow padded output, masked vst)
    logits = jnp.dot(h2.astype(jnp.bfloat16), wh_ref[...],
                     preferred_element_type=jnp.float32) + bh
    out_ref[...] = jax.nn.sigmoid(logits)


def pack_params(w1, b1, w2, b2, wj, bj, wb, bb):
    """Pack params: bf16 weights, fused head (padded to a multiple of 8 lanes),
    one f32 bias table.  Returns a dict of ARRAYS ONLY (jit-safe pytree)."""
    num_buttons = wb.shape[1]
    head_out = 1 + num_buttons
    head_pad = _round_up(head_out, 8)        # small pad: masked store, 8x less HBM write

    wh = jnp.concatenate([wj, wb], axis=1)                   # (128, head_out)
    wh = jnp.pad(wh, ((0, 0), (0, head_pad - head_out)))     # (128, head_pad)

    bias_cols = max(256, head_pad)
    b_packed = jnp.zeros((3, bias_cols), jnp.float32)
    b_packed = b_packed.at[0, :256].set(b1.reshape(-1))
    b_packed = b_packed.at[1, :128].set(b2.reshape(-1))
    b_packed = b_packed.at[2, :head_out].set(
        jnp.concatenate([bj.reshape(-1), bb.reshape(-1)]))

    return dict(
        w1=w1.astype(jnp.bfloat16),
        w2=w2.astype(jnp.bfloat16),
        wh=wh.astype(jnp.bfloat16),
        bias=b_packed,
    )


@functools.partial(jax.jit, static_argnames=("num_buttons", "tile_b"))
def cb2aiv2_forward(x, params, *, num_buttons, tile_b=2048):
    """x: (B, input_dim), ideally bf16 (f32 also accepted).
    Returns (joystick (B,1) f32, buttons (B,num_buttons) f32)."""
    B, input_dim = x.shape
    w1, w2, wh, bias = params["w1"], params["w2"], params["wh"], params["bias"]
    head_pad = wh.shape[1]                   # static (from shape), not traced
    head_out = 1 + num_buttons

    # Batch tiling: 16-sublane alignment (safe for bf16 and f32 tiles).
    ALIGN = 16
    B_al = _round_up(B, ALIGN)
    tb = min(_round_up(tile_b, ALIGN), B_al)
    # Keep >= 2 grid steps when the batch allows it so v7x's two TensorCores
    # both get work via the "parallel" axis; no-op for large batches.
    if B_al >= 2 * ALIGN:
        tb = min(tb, _round_up(B_al // 2, ALIGN))
    B_pad = _round_up(B_al, tb)
    if B_pad != B:
        x = jnp.pad(x, ((0, B_pad - B), (0, 0)))
    grid = (B_pad // tb,)

    out = pl.pallas_call(
        _mlp_kernel,
        out_shape=jax.ShapeDtypeStruct((B_pad, head_pad), jnp.float32),
        grid=grid,
        in_specs=[
            pl.BlockSpec((tb, input_dim), lambda i: (i, 0)),   # x tile
            pl.BlockSpec(w1.shape, lambda i: (0, 0)),          # weights stay VMEM-resident
            pl.BlockSpec(w2.shape, lambda i: (0, 0)),
            pl.BlockSpec(wh.shape, lambda i: (0, 0)),
            pl.BlockSpec(bias.shape, lambda i: (0, 0)),
        ],
        out_specs=pl.BlockSpec((tb, head_pad), lambda i: (i, 0)),
        compiler_params=pltpu.CompilerParams(
            dimension_semantics=("parallel",),
            vmem_limit_bytes=32 * 1024 * 1024),
    )(x, w1, w2, wh, bias)

    joy = out[:B, 0:1]
    btn = out[:B, 1:head_out]
    return joy, btn


def init_params(key, input_dim, num_buttons):
    """PyTorch-Linear-style init (uniform +/- 1/sqrt(fan_in)); weights as (in, out)."""
    def linear(k, fan_in, fan_out):
        kw, kb = jax.random.split(k)
        bound = 1.0 / jnp.sqrt(jnp.float32(fan_in))
        w = jax.random.uniform(kw, (fan_in, fan_out), jnp.float32, -bound, bound)
        b = jax.random.uniform(kb, (1, fan_out), jnp.float32, -bound, bound)
        return w, b

    k1, k2, k3, k4 = jax.random.split(key, 4)
    w1, b1 = linear(k1, input_dim, 256)
    w2, b2 = linear(k2, 256, 128)
    wj, bj = linear(k3, 128, 1)
    wb, bb = linear(k4, 128, num_buttons)
    return (w1, b1, w2, b2, wj, bj, wb, bb)


def _reference(x, raw_params):
    w1, b1, w2, b2, wj, bj, wb, bb = raw_params
    h1 = jnp.maximum(x @ w1 + b1, 0.0)
    h2 = jnp.maximum(h1 @ w2 + b2, 0.0)
    return jax.nn.sigmoid(h2 @ wj + bj), jax.nn.sigmoid(h2 @ wb + bb)


if __name__ == "__main__":
    key = jax.random.PRNGKey(0)
    k_in, k_p = jax.random.split(key)

    batch = 4            # small; kernel pads batch to the tile internally
    input_dim = 32
    num_buttons = 8

    x_f32 = jax.random.normal(k_in, (batch, input_dim), jnp.float32)
    x = x_f32.astype(jnp.bfloat16)           # bf16 input contract (cast once, outside jit)
    raw_params = init_params(k_p, input_dim, num_buttons)
    params = pack_params(*raw_params)

    joy, btn = cb2aiv2_forward(x, params, num_buttons=num_buttons)
    jax.block_until_ready((joy, btn))

    # Reference sees the same bf16-quantized input (upcast to f32), f32 weights.
    joy_ref, btn_ref = _reference(x.astype(jnp.float32), raw_params)
    assert joy.shape == (batch, 1) and btn.shape == (batch, num_buttons)
    # bf16 matmul operands (f32 accumulation) -> loosened tolerance.
    assert jnp.allclose(joy, joy_ref, atol=2e-2), float(jnp.max(jnp.abs(joy - joy_ref)))
    assert jnp.allclose(btn, btn_ref, atol=2e-2), float(jnp.max(jnp.abs(btn - btn_ref)))

    print("KERNEL_OK")
</pallas_src>

<mosaic_0001>
module attributes {stable_mosaic.version = 11 : i64} {
  func.func @_mlp_kernel(%arg0: i32, %arg1: memref<16x32xbf16, #tpu.memory_space<vmem>>, %arg2: memref<32x256xbf16, #tpu.memory_space<vmem>>, %arg3: memref<256x128xbf16, #tpu.memory_space<vmem>>, %arg4: memref<128x16xbf16, #tpu.memory_space<vmem>>, %arg5: memref<3x256xf32, #tpu.memory_space<vmem>>, %arg6: memref<16x16xf32, #tpu.memory_space<vmem>>) attributes {dimension_semantics = [#tpu.dimension_semantics<parallel>], iteration_bounds = array<i64: 1>, scalar_prefetch = 0 : i64, scratch_operands = 0 : i64, tpu.core_type = #tpu.core_type<tc>, window_params = [{transform_indices = @transform_0, window_bounds = array<i64: 16, 32>}, {pipeline_mode = #tpu.pipeline_mode<synchronous>, transform_indices = @transform_1, window_bounds = array<i64: 32, 256>}, {pipeline_mode = #tpu.pipeline_mode<synchronous>, transform_indices = @transform_2, window_bounds = array<i64: 256, 128>}, {pipeline_mode = #tpu.pipeline_mode<synchronous>, transform_indices = @transform_3, window_bounds = array<i64: 128, 16>}, {pipeline_mode = #tpu.pipeline_mode<synchronous>, transform_indices = @transform_4, window_bounds = array<i64: 3, 256>}, {transform_indices = @transform_5, window_bounds = array<i64: 16, 16>}]} {
    %c0 = arith.constant 0 : index
    %c0_0 = arith.constant 0 : index
    %0 = vector.load %arg5[%c0, %c0_0] : memref<3x256xf32, #tpu.memory_space<vmem>>, vector<3x256xf32>
    %1 = vector.extract_strided_slice %0 {offsets = [0, 0], sizes = [1, 256], strides = [1, 1]} : vector<3x256xf32> to vector<1x256xf32>
    %2 = vector.extract_strided_slice %0 {offsets = [1, 0], sizes = [1, 128], strides = [1, 1]} : vector<3x256xf32> to vector<1x128xf32>
    %3 = vector.extract_strided_slice %0 {offsets = [2, 0], sizes = [1, 16], strides = [1, 1]} : vector<3x256xf32> to vector<1x16xf32>
    %c0_1 = arith.constant 0 : index
    %c0_2 = arith.constant 0 : index
    %4 = vector.load %arg1[%c0_1, %c0_2] : memref<16x32xbf16, #tpu.memory_space<vmem>>, vector<16x32xbf16>
    %c0_3 = arith.constant 0 : index
    %c0_4 = arith.constant 0 : index
    %5 = vector.load %arg2[%c0_3, %c0_4] : memref<32x256xbf16, #tpu.memory_space<vmem>>, vector<32x256xbf16>
    %cst = arith.constant dense<0.000000e+00> : vector<16x256xf32>
    %6 = tpu.matmul %4, %5, %cst {dimension_numbers = #tpu.dot_dimension_numbers<[1], [0], [0], [1], [0, 0, 1, 1], [], []>} : vector<16x32xbf16>, vector<32x256xbf16>, vector<16x256xf32> -> vector<16x256xf32>
    %7 = vector.broadcast %1 : vector<1x256xf32> to vector<16x256xf32>
    %8 = arith.addf %6, %7 : vector<16x256xf32>
    %cst_5 = arith.constant 0.000000e+00 : f32
    %9 = vector.broadcast %cst_5 : f32 to vector<16x256xf32>
    %10 = arith.maximumf %8, %9 : vector<16x256xf32>
    %11 = arith.truncf %10 : vector<16x256xf32> to vector<16x256xbf16>
    %c0_6 = arith.constant 0 : index
    %c0_7 = arith.constant 0 : index
    %12 = vector.load %arg3[%c0_6, %c0_7] : memref<256x128xbf16, #tpu.memory_space<vmem>>, vector<256x128xbf16>
    %cst_8 = arith.constant dense<0.000000e+00> : vector<16x128xf32>
    %13 = tpu.matmul %11, %12, %cst_8 {dimension_numbers = #tpu.dot_dimension_numbers<[1], [0], [0], [1], [0, 0, 1, 1], [], []>} : vector<16x256xbf16>, vector<256x128xbf16>, vector<16x128xf32> -> vector<16x128xf32>
    %14 = vector.broadcast %2 : vector<1x128xf32> to vector<16x128xf32>
    %15 = arith.addf %13, %14 : vector<16x128xf32>
    %cst_9 = arith.constant 0.000000e+00 : f32
    %16 = vector.broadcast %cst_9 : f32 to vector<16x128xf32>
    %17 = arith.maximumf %15, %16 : vector<16x128xf32>
    %18 = arith.truncf %17 : vector<16x128xf32> to vector<16x128xbf16>
    %c0_10 = arith.constant 0 : index
    %c0_11 = arith.constant 0 : index
    %19 = vector.load %arg4[%c0_10, %c0_11] : memref<128x16xbf16, #tpu.memory_space<vmem>>, vector<128x16xbf16>
    %cst_12 = arith.constant dense<0.000000e+00> : vector<16x16xf32>
    %20 = tpu.matmul %18, %19, %cst_12 {dimension_numbers = #tpu.dot_dimension_numbers<[1], [0], [0], [1], [0, 0, 1, 1], [], []>} : vector<16x128xbf16>, vector<128x16xbf16>, vector<16x16xf32> -> vector<16x16xf32>
    %21 = vector.broadcast %3 : vector<1x16xf32> to vector<16x16xf32>
    %22 = arith.addf %20, %21 : vector<16x16xf32>
    %23 = arith.negf %22 : vector<16x16xf32>
    %24 = math.exp %23 : vector<16x16xf32>
    %cst_13 = arith.constant 1.000000e+00 : f32
    %25 = vector.broadcast %cst_13 : f32 to vector<16x16xf32>
    %26 = arith.addf %25, %24 : vector<16x16xf32>
    %27 = arith.divf %25, %26 : vector<16x16xf32>
    %c0_14 = arith.constant 0 : index
    %c0_15 = arith.constant 0 : index
    %28 = vector.load %arg6[%c0_14, %c0_15] : memref<16x16xf32, #tpu.memory_space<vmem>>, vector<16x16xf32>
    tpu.vector_store %arg6[%c0_14, %c0_15], %27 {strides = array<i32>} : memref<16x16xf32, #tpu.memory_space<vmem>>, vector<16x16xf32>,
    return
  }
  func.func @transform_0(%arg0: i32) -> (i32, i32) {
    %c0_i32 = arith.constant 0 : i32
    %c0_i32_0 = arith.constant 0 : i32
    return %arg0, %c0_i32 : i32, i32
  }
  func.func @transform_1(%arg0: i32) -> (i32, i32) {
    %c0_i32 = arith.constant 0 : i32
    %c0_i32_0 = arith.constant 0 : i32
    %c0_i32_1 = arith.constant 0 : i32
    return %c0_i32, %c0_i32_0 : i32, i32
  }
  func.func @transform_2(%arg0: i32) -> (i32, i32) {
    %c0_i32 = arith.constant 0 : i32
    %c0_i32_0 = arith.constant 0 : i32
    %c0_i32_1 = arith.constant 0 : i32
    return %c0_i32, %c0_i32_0 : i32, i32
  }
  func.func @transform_3(%arg0: i32) -> (i32, i32) {
    %c0_i32 = arith.constant 0 : i32
    %c0_i32_0 = arith.constant 0 : i32
    %c0_i32_1 = arith.constant 0 : i32
    return %c0_i32, %c0_i32_0 : i32, i32
  }
  func.func @transform_4(%arg0: i32) -> (i32, i32) {
    %c0_i32 = arith.constant 0 : i32
    %c0_i32_0 = arith.constant 0 : i32
    %c0_i32_1 = arith.constant 0 : i32
    return %c0_i32, %c0_i32_0 : i32, i32
  }
  func.func @transform_5(%arg0: i32) -> (i32, i32) {
    %c0_i32 = arith.constant 0 : i32
    %c0_i32_0 = arith.constant 0 : i32
    return %arg0, %c0_i32 : i32, i32
  }
}

</mosaic_0001>

<bundles_post_ra>
// kernel: cb2aiv2_forward.1
= control target key start
LH: loop header
LB: loop body
LE: loop exit
PB: predicated region body
PF: predicated region fallthrough
CT: control target
= control target key end

     0   :  { %10 = vsyncpa [#allocation3], 0  ;;  %s596_s18 = smov [#allocation2]   ;;  %s692_s0 = inlined_call_operand.vmem [shape: bf16[16,32], index: 0, kind: input, shape index: {}]   ;;  %s693_s1 = inlined_call_operand.vmem [shape: bf16[32,256], index: 1, kind: input, shape index: {}]   ;;  %s694_s2 = inlined_call_operand.hbm [shape: bf16[256,128], index: 2, kind: input, shape index: {}]   ;;  %s695_s3 = inlined_call_operand.vmem [shape: bf16[128,16], index: 3, kind: input, shape index: {}]   ;;  %s696_s4 = inlined_call_operand.vmem [shape: f32[3,256], index: 4, kind: input, shape index: {}]   ;;  %s697_s5 = inlined_call_operand.vmem [shape: f32[16,16], index: 5, kind: output, shape index: {}]  }
   0x1   :  { %s20_s19 = sshll.u32 %s596_s18, 4  ;;  %s572_s22 = scalar_lea.hbm %s694_s2, 2048  ;;  %s21_s19 = int_to_ptr.vmem [resolvable:$true] %s20_s19 }
   0x2   :  { %p573_p0 = scmp.ne.s32.totalorder %s694_s2, %s572_s22  ;;  %p576_p1 = scmp.lt.u32.totalorder %s572_s22, %s694_s2 }
   0x4   :  { %p578_p2 = pnand %p576_p1, %p573_p0 }
   0x6   :  { %581 = shalt.err (!%p578_p2)
}
   0x7   :  { %s582_s27 = scalar_lea.vmem %s21_s19, 2048  ;;  %p587_p4 = scmp.lt.s32.totalorder %s21_s19, %s21_s19 }
   0x8   :  { %p583_p3 = scmp.ne.s32.totalorder %s21_s19, %s582_s27  ;;  %p588_p5 = scmp.lt.s32.totalorder %s582_s27, %s582_s27 }
   0xa   :  { %p589_p6 = por %p588_p5, %p587_p4 }
   0xc   :  { %p590_p7 = pnand %p589_p6, %p583_p3 }
   0xe   :  { %593 = shalt.err (!%p590_p7)
}
   0xf   :  { %s597_s28 = smov 64   ;;  %s598_s29 = smov 4  }
  0x10   :  { %26 = dma.hbm_to_vmem [thread:$0]  %s694_s2, 2048, %s21_s19, [#allocation3], %s597_s28, %s597_s28, %s598_s29  }
  0x11   :  { %594 = dma.done.wait [#allocation3], 2048  }
  0x12   :  { %595 = vsyncadd [#allocation3], 4294965248  ;;  %v599_v0 = vmov 0   ;;  %v533_v1 = vld [vmem:[%s693_s1 + $0x4] ss:$8 sps:$4 sm:$0xff]   ;;  %vm86_vm0 = vcmask 261120   ;;  %v43_v28 = vlaneseq }
  0x13   :  { %122 = vmatprep.mubr.bf16.mxu0 %v599_v0  ;;  %v535_v2 = vld [vmem:[%s693_s1] ss:$8 sps:$4 sm:$0xff]   ;;  %90 = vmatprep.subr.bf16.mxu0 %v533_v1  ;;  %v536_v3 = vld [vmem:[%s693_s1 + $0x14] ss:$8 sps:$4 sm:$0xff]   ;;  %v538_v4 = vld [vmem:[%s693_s1 + $0x10] ss:$8 sps:$4 sm:$0xff]  }
  0x14   :  { %91 = vmatpush1.bf16.msra.mxu0 %v535_v2  ;;  %v539_v5 = vld [vmem:[%s692_s0] sm:$0xff]   ;;  %v542_v8 = vld [vmem:[#allocation2 + $0x48] sm:$0xff]   ;;  %v544_v10 = vld [vmem:[#allocation2 + $0x50] sm:$0xff]   ;;  %v600_v23 = vmov 0.0   ;;  %v44_v29 = vshrl.u32 %v43_v28, 7  ;;  %vm601_vm1 = vmmov 0  }
  0x15   :  { %92 = vmatprep.subr.bf16.mxu0 %v536_v3  ;;  %v540_v6 = vld [vmem:[#allocation2 + $0x40] sm:$0xff]   ;;  %v543_v9 = vld [vmem:[#allocation2 + $0x8] sm:$0xff]   ;;  %v545_v11 = vld [vmem:[#allocation2 + $0x10] sm:$0xff]   ;;  %vm436_vm2 = vcmask 130048  }
  0x16   :  { %v541_v7 = vld [vmem:[#allocation2] sm:$0xff]   ;;  %476 = vmatprep.subr.bf16.mxu1 %v540_v6  ;;  %v546_v12 = vld [vmem:[#allocation2 + $0x58] sm:$0xff]   ;;  %v550_v16 = vld [vmem:[#allocation2 + $0x68] sm:$0xff]   ;;  %v45_v30 = vsub.s32 0, %v44_v29  ;;  %v49_v32 = vsub.s32 4, %v44_v29  ;;  %v173_v54 = vsub.s32 1, %v44_v29 }
  0x17   :  { %477 = vmatpush3.bf16.msra.mxu1 %v541_v7  ;;  %v547_v13 = vld [vmem:[#allocation2 + $0x18] sm:$0xff]   ;;  %v548_v14 = vld [vmem:[#allocation2 + $0x60] sm:$0xff]   ;;  %v551_v17 = vld [vmem:[#allocation2 + $0x28] sm:$0xff]   ;;  %v333_v3 = vsub.s32 2, %v44_v29 }
  0x18   :  { %93 = vmatpush1.bf16.msra.mxu0 %v538_v4  ;;  %478 = vmatprep.subr.bf16.mxu1 %v542_v8  ;;  %v549_v15 = vld [vmem:[#allocation2 + $0x20] sm:$0xff]   ;;  %v552_v18 = vld [vmem:[#allocation2 + $0x70] sm:$0xff]   ;;  %v554_v20 = vld [vmem:[#allocation2 + $0x78] sm:$0xff]  }
  0x19   :  { %v553_v19 = vld [vmem:[#allocation2 + $0x30] sm:$0xff]   ;;  %v555_v21 = vld [vmem:[#allocation2 + $0x38] sm:$0xff]   ;;  %v556_v22 = vld [vmem:[%s695_s3] sm:$0xff]   ;;  %507 = vmatprep.subr.bf16.mxu0 %v600_v23 }
  0x1a   :  { %v557_v24 = vld [vmem:[%s695_s3 + $0x8] sm:$0xff]   ;;  %v558_v25 = vld [vmem:[%s695_s3 + $0x10] sm:$0xff]   ;;  %v559_v26 = vld [vmem:[%s695_s3 + $0x18] sm:$0xff]  }
  0x1b   :  { %449 = vmatmul.mubr.msk.bf16.vlgmr.msra.gmra.mrb[0].mxu0 %vm86_vm0, %v539_v5  ;;  %479 = vmatpush3.bf16.msra.mxu1 %v543_v9  ;;  %v560_v27 = vld [vmem:[%s695_s3 + $0x20] sm:$0xff]   ;;  %v561_v51 = vld [vmem:[%s695_s3 + $0x28] sm:$0xff]   ;;  %v562_v52 = vld [vmem:[%s695_s3 + $0x30] sm:$0xff]  }
  0x1c   :  { %480 = vmatprep.subr.bf16.mxu1 %v544_v10  ;;  %508 = vmatpush3.bf16.msra.mxu0 %v556_v22  ;;  %v35_v31 = vld [vmem:[%s696_s4] sm:$0x77]  ;;  %v563_v53 = vld [vmem:[%s695_s3 + $0x38] sm:$0xff]  }
  0x1d   :  { %509 = vmatprep.subr.bf16.mxu0 %v600_v23  ;;  %v46_v33 = vrot.slane %v35_v31, %v45_v30  ;;  %v50_v34 = vrot.slane %v35_v31, %v49_v32  ;;  %523 = vmatprep.mubr.msk.bf16.mxu0 %vm601_vm1, %v600_v23  ;;  %v174_v56 = vrot.slane %v35_v31, %v173_v54 }
  0x1e   :  { %v334_v4 = vrot.slane %v35_v31, %v333_v3 }
  0x1f   :  { %481 = vmatpush3.bf16.msra.mxu1 %v545_v11  ;;  %v56_v35 = vrot.slane %v46_v33, %v45_v30  ;;  %v60_v36 = vrot.slane %v50_v34, %v45_v30 }
  0x20   :  { %482 = vmatprep.subr.bf16.mxu1 %v546_v12  ;;  %510 = vmatpush3.bf16.msra.mxu0 %v557_v24 }
  0x21   :  { %511 = vmatprep.subr.bf16.mxu0 %v600_v23 }
  0x23   :  { %483 = vmatpush3.bf16.msra.mxu1 %v547_v13 }
  0x24   :  { %484 = vmatprep.subr.bf16.mxu1 %v548_v14  ;;  %512 = vmatpush3.bf16.msra.mxu0 %v558_v25 }
  0x25   :  { %513 = vmatprep.subr.bf16.mxu0 %v600_v23 }
  0x27   :  { %485 = vmatpush3.bf16.msra.mxu1 %v549_v15 }
  0x28   :  { %486 = vmatprep.subr.bf16.mxu1 %v550_v16  ;;  %514 = vmatpush3.bf16.msra.mxu0 %v559_v26 }
  0x29   :  { %515 = vmatprep.subr.bf16.mxu0 %v600_v23 }
  0x2b   :  { %487 = vmatpush3.bf16.msra.mxu1 %v551_v17 }
  0x2c   :  { %488 = vmatprep.subr.bf16.mxu1 %v552_v18  ;;  %516 = vmatpush3.bf16.msra.mxu0 %v560_v27 }
  0x2d   :  { %517 = vmatprep.subr.bf16.mxu0 %v600_v23 }
  0x2f   :  { %489 = vmatpush3.bf16.msra.mxu1 %v553_v19 }
  0x30   :  { %490 = vmatprep.subr.bf16.mxu1 %v554_v20  ;;  %518 = vmatpush3.bf16.msra.mxu0 %v561_v51 }
  0x31   :  { %519 = vmatprep.subr.bf16.mxu0 %v600_v23 }
  0x33   :  { %491 = vmatpush3.bf16.msra.mxu1 %v555_v21 }
  0x34   :  { %520 = vmatpush3.bf16.msra.mxu0 %v562_v52 }
  0x35   :  { %521 = vmatprep.subr.bf16.mxu0 %v600_v23 }
  0x38   :  { %522 = vmatpush3.bf16.msra.mxu0 %v563_v53 }
  0xee   :  { %v124_v37 = vpop.f32.mrb[0].mxu0 }
  0xef   :  { %v125_v38 = vadd.f32 %v124_v37, %v56_v35  ;;  %v126_v39 = vpop.f32.mrb[1].mxu0 }
  0xf0   :  { %v127_v40 = vadd.f32 %v126_v39, %v60_v36  ;;  %v128_v41 = vpop.f32.mrb[2].mxu0 }
  0xf1   :  { %v129_v42 = vadd.f32 %v128_v41, %v56_v35  ;;  %v130_v43 = vpop.f32.mrb[3].mxu0  ;;  %v133_v45 = vmax.f32 %v125_v38, 0.0 }
  0xf2   :  { %v131_v44 = vadd.f32 %v130_v43, %v60_v36  ;;  %v134_v47 = vmax.f32 %v127_v40, 0.0 }
  0xf3   :  { %v135_v46 = vmax.f32 %v129_v42, 0.0 }
  0xf4   :  { %v136_v48 = vmax.f32 %v131_v44, 0.0 }
  0xf5   :  { %v137_v49 = vpack.c.bf16 %v135_v46, %v133_v45 }
  0xf6   :  { %v138_v50 = vpack.c.bf16 %v136_v48, %v134_v47 }
  0xf8   :  { %303 = vmatprep.mubr.bf16.mxu1 %v138_v50 }
  0xf9   :  { %304 = vmatmul.mubr.bf16.vlgmr.msra.gmra.mrb[0].mxu1 %v137_v49 }
 0x1cc   :  { %v492_v55 = vpop.f32.mrb[0].mxu1 }
 0x1cd   :  { %v493_v57 = vpop.f32.mrb[1].mxu1 }
 0x1ce   :  { %v494_v58 = vadd.f32 %v493_v57, %v492_v55  ;;  %v495_v59 = vpop.f32.mrb[2].mxu1 }
 0x1cf   :  { %v496_v60 = vpop.f32.mrb[3].mxu1 }
 0x1d0   :  { %v306_v61 = vadd.f32 %v494_v58, %v174_v56  ;;  %v497_v62 = vadd.f32 %v496_v60, %v495_v59 }
 0x1d2   :  { %v309_v63 = vadd.f32 %v497_v62, %v174_v56  ;;  %v312_v0 = vmax.f32 %v306_v61, 0.0 }
 0x1d4   :  { %v313_v1 = vmax.f32 %v309_v63, 0.0 }
 0x1d6   :  { %v314_v2 = vpack.c.bf16 %v313_v1, %v312_v0 }
 0x1d8   :  { %524 = vmatmul.mubr.bf16.vlgmr.msra.gmra.mrb[4].mxu0 %v314_v2 }
 0x2ab   :  { %v417_v5 = vpop.f32.mrb[4].mxu0 }
 0x2ac   :  { %v418_v6 = vadd.f32 %v417_v5, %v334_v4  ;;  %v525_v7 = vpop.f32.mrb[5].mxu0 }
 0x2ad   :  { %v420_v8 = vpop.f32.mrb[6].mxu0 }
 0x2ae   :  { %v474_v9 = vmul.f32 -1.442695, %v418_v6  ;;  %v421_v10 = vadd.f32 %v420_v8, %v334_v4  ;;  %v526_v11 = vpop.f32.mrb[7].mxu0 }
 0x2b0   :  { %564 = vpow2.f32 %v474_v9  ;;  %v475_v12 = vmul.f32 -1.442695, %v421_v10 }
 0x2b2   :  { %566 = vpow2.f32 %v475_v12 }
 0x2ba   :  { %v565_v13 = vpop.eup %564 }
 0x2bb   :  { %v430_v14 = vadd.f32 1.0, %v565_v13 }
 0x2bc   :  { %v567_v15 = vpop.eup %566 }
 0x2bd   :  { %568 = vrcp.f32 %v430_v14  ;;  %v431_v16 = vadd.f32 1.0, %v567_v15 }
 0x2bf   :  { %570 = vrcp.f32 %v431_v16 }
 0x2c7   :  { %v569_v17 = vpop.eup %568 }
 0x2c8   :  { %437 = vst.msk [vmem:[%s697_s5] sm:$0xff] %vm436_vm2, %v569_v17 }
 0x2c9   :  { %v571_v18 = vpop.eup %570 }
 0x2ca   :  { %438 = vst.msk [vmem:[%s697_s5 + $0x8] sm:$0xff] %vm436_vm2, %v571_v18 }
 0x2cb   :  { %443 = vsyncpa [#allocation3], 1 }

</bundles_post_ra>
